<compile_context>
chip_gen: v5e
topology: v5e:2x2
jax: 0.10.0
libtpu: 0.0.40
codegen_flags: <defaults>
</compile_context>

<pallas_src>
import functools

import jax
import jax.numpy as jnp
from jax import lax
from jax.experimental import pallas as pl
from jax.experimental.pallas import tpu as pltpu


def _round_up(x, m):
    return (x + m - 1) // m * m


# ---------------------------------------------------------------------------
# Pass 1: att[b] = q[b] @ k[b]^T, accumulated over N tiles.
# ---------------------------------------------------------------------------
def _cam_att_kernel(q_ref, k_ref, att_ref, *, mxu_dtype):
    # q_ref, k_ref: (BB, C, TN); att_ref: (BB, C, C) f32 output block resident
    # across the N grid axis (same block index for every n) -> accumulator.
    @pl.when(pl.program_id(1) == 0)
    def _init():
        att_ref[...] = jnp.zeros_like(att_ref)

    q = q_ref[...].astype(mxu_dtype)
    k = k_ref[...].astype(mxu_dtype)
    # NT-style contraction over the lane dim of both operands; no k.T temp.
    att_ref[...] += lax.dot_general(
        q, k,
        dimension_numbers=(((2,), (2,)), ((0,), (0,))),
        preferred_element_type=jnp.float32,
    )


# ---------------------------------------------------------------------------
# Pass 2: out[b, :, n_tile] = att[b] @ v[b, :, n_tile] + v[b, :, n_tile]
# ---------------------------------------------------------------------------
def _cam_apply_kernel(att_ref, v_ref, o_ref, *, mxu_dtype):
    v = v_ref[...]
    # Deliberate: att (accumulated in f32) is cast to the MXU input dtype
    # (bf16 when the inputs are bf16); the matmul still accumulates in f32.
    att = att_ref[...].astype(mxu_dtype)
    out = lax.dot_general(
        att, v.astype(mxu_dtype),
        dimension_numbers=(((2,), (1,)), ((0,), (0,))),
        preferred_element_type=jnp.float32,
    )
    # Residual add in f32, single downcast at the store.
    o_ref[...] = (out + v.astype(jnp.float32)).astype(o_ref.dtype)


def cam_module(v1, q1, k1, *, channels, height, width,
               tn=None, block_b=None, mxu_dtype=None):
    """Pallas implementation of CAM_Module.forward (NCHW inputs)."""
    B = v1.shape[0]
    C = channels
    N = height * width
    dtype = v1.dtype
    itemsize = jnp.dtype(dtype).itemsize
    if mxu_dtype is None:
        mxu_dtype = dtype

    # ---- layout padding (wrapper-side plumbing; zero padding is exact) ----
    c_pad = _round_up(C, 8)           # sublane-friendly channel count
    n_pad = _round_up(N, 128)         # lane-dense spatial dim

    # ---- batch blocking: fill MXU rows / amortize per-step overhead -------
    if block_b is None:
        block_b = 1
        if c_pad < 128:
            for d in range(B, 0, -1):
                if B % d == 0 and d * c_pad <= 128:
                    block_b = d
                    break
    bb = block_b
    assert B % bb == 0, "block_b must divide the batch size"

    # ---- N tile: 128-aligned, ~12 MiB per-step working set ----------------
    if tn is None:
        budget = 12 * 1024 * 1024
        fixed = 2 * bb * c_pad * c_pad * 4            # resident/buffered att
        per_tn = 4 * bb * c_pad * itemsize            # 2 inputs x 2 buffers
        tn = (max(budget - fixed, 0) // max(per_tn, 1)) // 128 * 128
        tn = max(128, min(2048, tn))
    tn = min(tn, n_pad)
    n_pad = _round_up(n_pad, tn)                      # exact grid
    num_b = B // bb
    num_n = n_pad // tn

    # ---- pad + reshape -----------------------------------------------------
    def prep(x):
        x = x.reshape(B, C, N)
        return jnp.pad(x, ((0, 0), (0, c_pad - C), (0, n_pad - N)))

    q = prep(q1)
    k = prep(k1)
    v = prep(v1)

    cn_spec = pl.BlockSpec((bb, c_pad, tn), lambda b, n: (b, 0, n))
    cc_spec = pl.BlockSpec((bb, c_pad, c_pad), lambda b, n: (b, 0, 0))

    # ---- pass 1: channel-affinity matrix (f32 accumulation over N) --------
    flops1 = 2 * B * c_pad * c_pad * n_pad
    bytes1 = 2 * B * c_pad * n_pad * itemsize + B * c_pad * c_pad * 4
    att = pl.pallas_call(
        functools.partial(_cam_att_kernel, mxu_dtype=mxu_dtype),
        out_shape=jax.ShapeDtypeStruct((B, c_pad, c_pad), jnp.float32),
        grid=(num_b, num_n),
        in_specs=[cn_spec, cn_spec],
        out_specs=cc_spec,
        compiler_params=pltpu.CompilerParams(
            dimension_semantics=("parallel", "arbitrary"),
            vmem_limit_bytes=32 * 1024 * 1024),
        cost_estimate=pl.CostEstimate(
            flops=flops1, transcendentals=0, bytes_accessed=bytes1),
    )(q, k)

    # ---- pass 2: apply attention, fuse residual add ------------------------
    flops2 = 2 * B * c_pad * c_pad * n_pad + B * c_pad * n_pad
    bytes2 = B * c_pad * c_pad * 4 + 2 * B * c_pad * n_pad * itemsize
    out = pl.pallas_call(
        functools.partial(_cam_apply_kernel, mxu_dtype=mxu_dtype),
        out_shape=jax.ShapeDtypeStruct((B, c_pad, n_pad), dtype),
        grid=(num_b, num_n),
        in_specs=[cc_spec, cn_spec],
        out_specs=cn_spec,
        compiler_params=pltpu.CompilerParams(
            dimension_semantics=("parallel", "parallel"),
            vmem_limit_bytes=32 * 1024 * 1024),
        cost_estimate=pl.CostEstimate(
            flops=flops2, transcendentals=0, bytes_accessed=bytes2),
    )(att, v)

    # Slice off the padding (exact) and restore NCHW.
    return out[:, :C, :N].reshape(B, C, height, width)


def cam_reference(v1, q1, k1, *, channels, height, width):
    B = v1.shape[0]
    N = height * width
    v = v1.reshape(B, channels, N).astype(jnp.float32)
    q = q1.reshape(B, channels, N).astype(jnp.float32)
    k = k1.reshape(B, channels, N).astype(jnp.float32)
    att = jnp.einsum("bcn,bdn->bcd", q, k)
    out = jnp.einsum("bcd,bdn->bcn", att, v)
    out = out.reshape(B, channels, height, width) + v1.astype(jnp.float32)
    return out.astype(v1.dtype)


if __name__ == "__main__":
    key = jax.random.PRNGKey(0)

    def run_case(B, C, H, W, **kw):
        kv, kq, kk = jax.random.split(jax.random.fold_in(key, C * H * W), 3)
        v1 = jax.random.normal(kv, (B, C, H, W), dtype=jnp.float32)
        q1 = jax.random.normal(kq, (B, C, H, W), dtype=jnp.float32)
        k1 = jax.random.normal(kk, (B, C, H, W), dtype=jnp.float32)

        out = cam_module(v1, q1, k1, channels=C, height=H, width=W, **kw)
        out = jax.block_until_ready(out)

        ref = cam_reference(v1, q1, k1, channels=C, height=H, width=W)
        assert out.shape == (B, C, H, W)
        assert jnp.allclose(out, ref, atol=1e-3, rtol=1e-3), \
            float(jnp.max(jnp.abs(out - ref)))

    # Small shape consistent with the module's (B, C, H, W) forward signature;
    # exercises batch folding (block_b=2 since C is small).
    run_case(2, 8, 4, 4)
    # Exercises N tiling / the accumulate path (N=144 -> padded 256 -> two
    # 128-wide tiles) with per-batch blocks.
    run_case(2, 16, 12, 12, tn=128, block_b=1)

    print("KERNEL_OK")
</pallas_src>

<mosaic_0001>
module attributes {stable_mosaic.version = 11 : i64} {
  func.func @_cam_att_kernel(%arg0: i32, %arg1: i32, %arg2: memref<2x8x128xf32, #tpu.memory_space<vmem>>, %arg3: memref<2x8x128xf32, #tpu.memory_space<vmem>>, %arg4: memref<2x8x8xf32, #tpu.memory_space<vmem>>) attributes {dimension_semantics = [#tpu.dimension_semantics<parallel>, #tpu.dimension_semantics<arbitrary>], iteration_bounds = array<i64: 1, 1>, scalar_prefetch = 0 : i64, scratch_operands = 0 : i64, tpu.core_type = #tpu.core_type<tc>, window_params = [{transform_indices = @transform_0, window_bounds = array<i64: 2, 8, 128>}, {transform_indices = @transform_1, window_bounds = array<i64: 2, 8, 128>}, {transform_indices = @transform_2, window_bounds = array<i64: 2, 8, 8>}]} {
    %c0_i32 = arith.constant 0 : i32
    %0 = arith.cmpi eq, %arg1, %c0_i32 : i32
    %1 = arith.extui %0 : i1 to i32
    %c0_i32_0 = arith.constant 0 : i32
    %2 = arith.cmpi ne, %1, %c0_i32_0 : i32
    scf.if %2 {
      %cst_12 = arith.constant 0.000000e+00 : f32
      %9 = vector.broadcast %cst_12 : f32 to vector<2x8x8xf32>
      %c0_13 = arith.constant 0 : index
      %c0_14 = arith.constant 0 : index
      %c0_15 = arith.constant 0 : index
      %10 = vector.load %arg4[%c0_13, %c0_14, %c0_15] : memref<2x8x8xf32, #tpu.memory_space<vmem>>, vector<2x8x8xf32>
      tpu.vector_store %arg4[%c0_13, %c0_14, %c0_15], %9 {strides = array<i32>} : memref<2x8x8xf32, #tpu.memory_space<vmem>>, vector<2x8x8xf32>,
    } else {
    }
    %c0 = arith.constant 0 : index
    %c0_1 = arith.constant 0 : index
    %c0_2 = arith.constant 0 : index
    %3 = vector.load %arg2[%c0, %c0_1, %c0_2] : memref<2x8x128xf32, #tpu.memory_space<vmem>>, vector<2x8x128xf32>
    %c0_3 = arith.constant 0 : index
    %c0_4 = arith.constant 0 : index
    %c0_5 = arith.constant 0 : index
    %4 = vector.load %arg3[%c0_3, %c0_4, %c0_5] : memref<2x8x128xf32, #tpu.memory_space<vmem>>, vector<2x8x128xf32>
    %c0_6 = arith.constant 0 : index
    %c0_7 = arith.constant 0 : index
    %c0_8 = arith.constant 0 : index
    %5 = vector.load %arg4[%c0_6, %c0_7, %c0_8] : memref<2x8x8xf32, #tpu.memory_space<vmem>>, vector<2x8x8xf32>
    %cst = arith.constant dense<0.000000e+00> : vector<2x8x8xf32>
    %6 = tpu.matmul %3, %4, %cst {dimension_numbers = #tpu.dot_dimension_numbers<[2], [2], [1], [1], [0, 0, 0, 1, 1, 1], [0], [0]>} : vector<2x8x128xf32>, vector<2x8x128xf32>, vector<2x8x8xf32> -> vector<2x8x8xf32>
    %7 = arith.addf %5, %6 : vector<2x8x8xf32>
    %c0_9 = arith.constant 0 : index
    %c0_10 = arith.constant 0 : index
    %c0_11 = arith.constant 0 : index
    %8 = vector.load %arg4[%c0_9, %c0_10, %c0_11] : memref<2x8x8xf32, #tpu.memory_space<vmem>>, vector<2x8x8xf32>
    tpu.vector_store %arg4[%c0_9, %c0_10, %c0_11], %7 {strides = array<i32>} : memref<2x8x8xf32, #tpu.memory_space<vmem>>, vector<2x8x8xf32>,
    return
  }
  func.func @transform_0(%arg0: i32, %arg1: i32) -> (i32, i32, i32) {
    %c0_i32 = arith.constant 0 : i32
    %c0_i32_0 = arith.constant 0 : i32
    return %arg0, %c0_i32, %arg1 : i32, i32, i32
  }
  func.func @transform_1(%arg0: i32, %arg1: i32) -> (i32, i32, i32) {
    %c0_i32 = arith.constant 0 : i32
    %c0_i32_0 = arith.constant 0 : i32
    return %arg0, %c0_i32, %arg1 : i32, i32, i32
  }
  func.func @transform_2(%arg0: i32, %arg1: i32) -> (i32, i32, i32) {
    %c0_i32 = arith.constant 0 : i32
    %c0_i32_0 = arith.constant 0 : i32
    %c0_i32_1 = arith.constant 0 : i32
    return %arg0, %c0_i32, %c0_i32_0 : i32, i32, i32
  }
}

</mosaic_0001>

<bundles_post_ra>
// kernel: tpu_custom_call.1
= control target key start
LH: loop header
LB: loop body
LE: loop exit
PB: predicated region body
PF: predicated region fallthrough
CT: control target
= control target key end

     0   :  { %7 = vsyncpa [#allocation3], 0  ;;  %s249_s0 = inlined_call_operand.hbm [shape: f32[2,8,128], index: 0, kind: input, shape index: {}]   ;;  %s250_s1 = inlined_call_operand.hbm [shape: f32[2,8,128], index: 1, kind: input, shape index: {}]   ;;  %s251_s2 = inlined_call_operand.hbm [shape: f32[2,8,8], index: 2, kind: output, shape index: {}]  }
   0x1   :  { %8 = vsyncpa [#allocation6], 0 }
   0x2   :  { %9 = vsyncpa [#allocation4], 0  ;;  %s14_s11 = sshll.u32 %s249_s0, 4  ;;  %s206_s12 = smov [#allocation2]   ;;  %s15_s11 = int_to_ptr.hbm [resolvable:$true] %s14_s11 }
   0x3   :  { %s16_s13 = sshll.u32 %s206_s12, 4  ;;  %s27_s16 = sshll.u32 %s250_s1, 4  ;;  %s17_s13 = int_to_ptr.vmem [resolvable:$true] %s16_s13  ;;  %s28_s16 = int_to_ptr.hbm [resolvable:$true] %s27_s16 }
   0x4   :  { %s207_s17 = smov 128   ;;  %s208_s18 = smov 8  }
   0x5   :  { %22 = dma.hbm_to_vmem [thread:$0]  %s15_s11, 256, %s17_s13, [#allocation3], %s207_s17, %s207_s17, %s208_s18  }
   0x6   :  { %s209_s19 = smov [#allocation5]  }
   0x7   :  { %s29_s20 = sshll.u32 %s209_s19, 4  ;;  %s30_s20 = int_to_ptr.vmem [resolvable:$true] %s29_s20 }
   0x8   :  { %35 = dma.hbm_to_vmem [thread:$0]  %s28_s16, 256, %s30_s20, [#allocation6], %s207_s17, %s207_s17, %s208_s18  }
   0x9   :  { %200 = dma.done.wait [#allocation3], 256  }
   0xa   :  { %201 = vsyncadd [#allocation3], 4294967040 }
   0xb   :  { %202 = dma.done.wait [#allocation6], 256  }
   0xc   :  { %203 = vsyncadd [#allocation6], 4294967040  ;;  %vm48_vm0 = vcmask 64512   ;;  %v210_v0 = vmov 0.0   ;;  %v53_v1 = vld [vmem:[#allocation5] sm:$0xff]  ;;  %v54_v2 = vld [vmem:[#allocation5 + $0x8] sm:$0xff] }
   0xd   :  { %49 = vst.msk [vmem:[#allocation7] sm:$0xff] %vm48_vm0, %v210_v0  ;;  %72 = vmatpush.xpose.msra.mxu0 %v53_v1  ;;  %92 = vmatpush.xpose.msra.mxu1 %v54_v2  ;;  %v51_v3 = vld [vmem:[#allocation2] sm:$0xff]  ;;  %v52_v4 = vld [vmem:[#allocation2 + $0x8] sm:$0xff]  ;;  %s211_s0 = smov [#allocation7]   ;;  %s108_s23 = sshll.u32 %s251_s2, 4  ;;  %s109_s23 = int_to_ptr.hbm [resolvable:$true] %s108_s23 }
   0xe   :  { %50 = vst.msk [vmem:[#allocation7 + $0x8] sm:$0xff] %vm48_vm0, %v210_v0  ;;  %s106_s1 = sshll.u32 %s211_s0, 4  ;;  %s107_s1 = int_to_ptr.vmem [resolvable:$true] %s106_s1 }
  0x10   :  { %73 = vmatmul.f32.vlgmr.msra.gmra.mxu0 %v51_v3  ;;  %93 = vmatmul.f32.vlgmr.msra.gmra.mxu1 %v52_v4 }
  0x14   :  { %v55_v5 = vld [vmem:[#allocation7] sm:$0xff] }
  0x15   :  { %v56_v6 = vld [vmem:[#allocation7 + $0x8] sm:$0xff] }
  0x8d   :  { %v74_v7 = vpop.f32.mrf.mxu0  ;;  %v94_v8 = vpop.f32.mrf.mxu1 }
  0x8e   :  { %v97_v9 = vadd.f32 %v74_v7, %v55_v5  ;;  %v98_v10 = vadd.f32 %v94_v8, %v56_v6 }
  0x90   :  { %100 = vst.msk [vmem:[#allocation7] sm:$0xff] %vm48_vm0, %v97_v9 }
  0x91   :  { %101 = vst.msk [vmem:[#allocation7 + $0x8] sm:$0xff] %vm48_vm0, %v98_v10 }
  0x92   :  { %114 = dma.vmem_to_hbm [thread:$0]  %s107_s1, 256, %s109_s23, [#allocation4], %s207_s17, %s207_s17, %s208_s18  }
  0x93   :  { %204 = dma.done.wait [#allocation4], 256  }
  0x94   :  { %205 = vsyncadd [#allocation4], 4294967040 }
  0x95   :  { %119 = vsyncpa [#allocation3], 1 }
  0x96   :  { %120 = vsyncpa [#allocation6], 1 }
  0x97   :  { %121 = vsyncpa [#allocation4], 1 }

</bundles_post_ra>
